<compile_context>
chip_gen: v7x
topology: tpu7x:2x2x1
jax: 0.10.0
libtpu: 0.0.40
codegen_flags: <defaults>
</compile_context>

<pallas_src>
import numpy as np
import jax
import jax.numpy as jnp
from jax.experimental import pallas as pl
from jax.experimental.pallas import tpu as pltpu

ORDER_1_17 = [(0, 1, 2, 3, 4), (5, 6), (7, 9), (8, 10), (11, 12), (13, 15), (14, 16)]
ORDER_2 = [(0, 1), (1, 2), (1, 3), (1, 4), (4, 5), (4, 6)]


def _round_up(x, m):
    return ((x + m - 1) // m) * m


# ----------------------------- Pallas kernel ------------------------------ #
def _hierarch_mlp_kernel(x_ref, w1_ref, b1_ref, w2_ref, b2_ref, w3_ref, b3_ref,
                         o_ref):
    # f32 input tile -> bf16 cast fused into the kernel (no extra HBM pass).
    x = x_ref[...].astype(w1_ref.dtype)
    # Stage 1: all 7 first_layer groups fused into one block-structured matmul
    # (bf16 operands, f32 accumulation / bias / ReLU).
    h1 = jnp.dot(x, w1_ref[...], preferred_element_type=jnp.float32) + b1_ref[...]
    h1 = jnp.maximum(h1, 0.0).astype(w2_ref.dtype)
    # Stage 2: all 6 second_layer groups fused.
    h2 = jnp.dot(h1, w2_ref[...], preferred_element_type=jnp.float32) + b2_ref[...]
    h2 = jnp.maximum(h2, 0.0).astype(w3_ref.dtype)
    # Stage 3: final Linear + ReLU, emitted at exactly D output lanes.
    h3 = jnp.dot(h2, w3_ref[...], preferred_element_type=jnp.float32) + b3_ref[...]
    o_ref[...] = jnp.maximum(h3, 0.0).astype(o_ref.dtype)


def _pick_tile_n(N, tile_n):
    """Node-tile size: one step for small N, >=2 even-ish steps otherwise."""
    if N <= tile_n:
        return _round_up(N, 8)
    # Large N: keep at least 2 grid steps (v7x megacore sharding of the
    # "parallel" axis) while staying at the requested tile size.
    return _round_up(min(tile_n, pl.cdiv(N, 2)), 8)


def hierarch_update_mlp(update, packed, *, tile_n=1024):
    """update: [N, J, D] float32; packed: block-structured packed weights.

    tile_n is the per-grid-step node count.  At the default 1024 the
    double-buffered VMEM working set is ~5 MiB (fits v5e's 16 MiB default
    scoped VMEM); v6e/v7x can use 2048 for slightly better overhead amortization.
    """
    N, J, D = update.shape
    w1, b1 = packed["w1"], packed["b1"]          # [J*D, S1], [1, S1]
    w2, b2 = packed["w2"], packed["b2"]          # [S1, S2],  [1, S2]
    w3, b3 = packed["w3"], packed["b3"]          # [S2, D],   [1, D]
    K1, S1 = w1.shape
    S2 = w2.shape[1]
    S3 = w3.shape[1]
    assert K1 == J * D and S3 == D

    # Input stays f32 (cast happens inside the kernel); reshape is free.
    x = update.reshape(N, J * D)

    tn = int(_pick_tile_n(N, tile_n))
    grid = (pl.cdiv(N, tn),)                     # ragged last tile handled by Pallas

    weight_bytes = 2 * (K1 * S1 + S1 * S2 + S2 * S3) + 4 * (S1 + S2 + S3)
    cost = pl.CostEstimate(
        flops=2 * N * (K1 * S1 + S1 * S2 + S2 * S3),
        transcendentals=0,
        bytes_accessed=N * 4 * K1 + N * 4 * S3 + weight_bytes,
    )

    out = pl.pallas_call(
        _hierarch_mlp_kernel,
        out_shape=jax.ShapeDtypeStruct((N, S3), jnp.float32),
        grid_spec=pltpu.PrefetchScalarGridSpec(
            num_scalar_prefetch=0,
            grid=grid,
            in_specs=[
                pl.BlockSpec((tn, J * D), lambda i: (i, 0)),
                # Constant index maps: weights/biases DMA'd once across grid.
                pl.BlockSpec((K1, S1), lambda i: (0, 0)),
                pl.BlockSpec((1, S1), lambda i: (0, 0)),
                pl.BlockSpec((S1, S2), lambda i: (0, 0)),
                pl.BlockSpec((1, S2), lambda i: (0, 0)),
                pl.BlockSpec((S2, S3), lambda i: (0, 0)),
                pl.BlockSpec((1, S3), lambda i: (0, 0)),
            ],
            out_specs=pl.BlockSpec((tn, S3), lambda i: (i, 0)),
        ),
        compiler_params=pltpu.CompilerParams(
            dimension_semantics=("parallel",)),
        cost_estimate=cost,
    )(x, w1, b1, w2, b2, w3, b3)

    return out


# ----------------------- parameter init / packing ------------------------- #
def init_params(key, node_dim, num_joints, *, weight_dtype=jnp.bfloat16):
    """Deterministic nn.Linear-style init (uniform +/- 1/sqrt(fan_in))."""
    assert num_joints == 17
    D, Dh, J = node_dim, node_dim // 2, num_joints

    def linear_init(k, fan_in, fan_out):
        kw, kb = jax.random.split(k)
        bound = 1.0 / np.sqrt(fan_in)
        w = jax.random.uniform(kw, (fan_out, fan_in), jnp.float32, -bound, bound)
        b = jax.random.uniform(kb, (fan_out,), jnp.float32, -bound, bound)
        return np.asarray(w), np.asarray(b)

    keys = jax.random.split(key, 7 + 6 + 1)
    raw = {"fw": [], "fb": [], "sw": [], "sb": []}
    for i, types in enumerate(ORDER_1_17):
        w, b = linear_init(keys[i], D * len(types), Dh)
        raw["fw"].append(w)
        raw["fb"].append(b)
    for i in range(6):
        w, b = linear_init(keys[7 + i], 2 * Dh, Dh)
        raw["sw"].append(w)
        raw["sb"].append(b)
    raw["final_w"], raw["final_b"] = linear_init(keys[13], 6 * Dh, D)

    # Intermediate stage widths lane-padded to 128 so h1/h2 vregs are
    # lane-dense; the final stage width stays exactly D (no padded writeback).
    S1 = _round_up(7 * Dh, 128)
    S2 = _round_up(6 * Dh, 128)
    S3 = D

    # Pack into block-structured dense matrices (x @ W + b convention).
    W1 = np.zeros((J * D, S1), np.float32)
    B1 = np.zeros((1, S1), np.float32)
    for i, types in enumerate(ORDER_1_17):
        WiT = raw["fw"][i].T                      # [len(types)*D, Dh]
        for k, j in enumerate(types):
            W1[j * D:(j + 1) * D, i * Dh:(i + 1) * Dh] = WiT[k * D:(k + 1) * D]
        B1[0, i * Dh:(i + 1) * Dh] = raw["fb"][i]

    W2 = np.zeros((S1, S2), np.float32)
    B2 = np.zeros((1, S2), np.float32)
    for i, types in enumerate(ORDER_2):
        WiT = raw["sw"][i].T                      # [2*Dh, Dh]
        for k, j in enumerate(types):
            W2[j * Dh:(j + 1) * Dh, i * Dh:(i + 1) * Dh] = WiT[k * Dh:(k + 1) * Dh]
        B2[0, i * Dh:(i + 1) * Dh] = raw["sb"][i]

    W3 = np.zeros((S2, S3), np.float32)
    B3 = np.zeros((1, S3), np.float32)
    W3[:6 * Dh, :] = raw["final_w"].T             # [6*Dh, D]
    B3[0, :] = raw["final_b"]

    packed = {
        "w1": jnp.asarray(W1, dtype=weight_dtype), "b1": jnp.asarray(B1),
        "w2": jnp.asarray(W2, dtype=weight_dtype), "b2": jnp.asarray(B2),
        "w3": jnp.asarray(W3, dtype=weight_dtype), "b3": jnp.asarray(B3),
    }
    return raw, packed


# --------------------------- pure-JAX reference ---------------------------- #
def reference_forward(update, raw):
    N = update.shape[0]
    out1 = []
    for i, types in enumerate(ORDER_1_17):
        xin = update[:, list(types), :].reshape(N, -1)
        out1.append(jax.nn.relu(xin @ raw["fw"][i].T + raw["fb"][i]))
    out1 = jnp.stack(out1, axis=1)
    out2 = []
    for i, types in enumerate(ORDER_2):
        xin = out1[:, list(types), :].reshape(N, -1)
        out2.append(jax.nn.relu(xin @ raw["sw"][i].T + raw["sb"][i]))
    out2 = jnp.stack(out2, axis=1).reshape(N, -1)
    return jax.nn.relu(out2 @ raw["final_w"].T + raw["final_b"])


# ---------------------------------- main ----------------------------------- #
if __name__ == "__main__":
    node_dim = 32       # node_dim // 2 = 16
    num_joints = 17
    num_nodes = 16

    key = jax.random.PRNGKey(0)
    k_param, k_x = jax.random.split(key)
    raw, packed = init_params(k_param, node_dim, num_joints)

    update = jax.random.normal(k_x, (num_nodes, num_joints, node_dim),
                               dtype=jnp.float32)

    out = jax.block_until_ready(hierarch_update_mlp(update, packed))
    ref = jax.block_until_ready(reference_forward(update, raw))

    assert out.shape == (num_nodes, node_dim)
    # bf16 weights / in-kernel bf16 cast with f32 accumulation -> loose tol.
    np.testing.assert_allclose(np.asarray(out), np.asarray(ref),
                               rtol=3e-2, atol=3e-2)
    print("KERNEL_OK")
</pallas_src>

<mosaic_0001>
module attributes {stable_mosaic.version = 11 : i64} {
  func.func @_hierarch_mlp_kernel(%arg0: i32, %arg1: memref<16x544xf32, #tpu.memory_space<vmem>>, %arg2: memref<544x128xbf16, #tpu.memory_space<vmem>>, %arg3: memref<1x128xf32, #tpu.memory_space<vmem>>, %arg4: memref<128x128xbf16, #tpu.memory_space<vmem>>, %arg5: memref<1x128xf32, #tpu.memory_space<vmem>>, %arg6: memref<128x32xbf16, #tpu.memory_space<vmem>>, %arg7: memref<1x32xf32, #tpu.memory_space<vmem>>, %arg8: memref<16x32xf32, #tpu.memory_space<vmem>>) attributes {dimension_semantics = [#tpu.dimension_semantics<parallel>], iteration_bounds = array<i64: 1>, scalar_prefetch = 0 : i64, scratch_operands = 0 : i64, tpu.core_type = #tpu.core_type<tc>, window_params = [{transform_indices = @transform_0, window_bounds = array<i64: 16, 544>}, {pipeline_mode = #tpu.pipeline_mode<synchronous>, transform_indices = @transform_1, window_bounds = array<i64: 544, 128>}, {pipeline_mode = #tpu.pipeline_mode<synchronous>, transform_indices = @transform_2, window_bounds = array<i64: 1, 128>}, {pipeline_mode = #tpu.pipeline_mode<synchronous>, transform_indices = @transform_3, window_bounds = array<i64: 128, 128>}, {pipeline_mode = #tpu.pipeline_mode<synchronous>, transform_indices = @transform_4, window_bounds = array<i64: 1, 128>}, {pipeline_mode = #tpu.pipeline_mode<synchronous>, transform_indices = @transform_5, window_bounds = array<i64: 128, 32>}, {pipeline_mode = #tpu.pipeline_mode<synchronous>, transform_indices = @transform_6, window_bounds = array<i64: 1, 32>}, {transform_indices = @transform_7, window_bounds = array<i64: 16, 32>}]} {
    %c0 = arith.constant 0 : index
    %c0_0 = arith.constant 0 : index
    %0 = vector.load %arg1[%c0, %c0_0] : memref<16x544xf32, #tpu.memory_space<vmem>>, vector<16x544xf32>
    %1 = arith.truncf %0 : vector<16x544xf32> to vector<16x544xbf16>
    %c0_1 = arith.constant 0 : index
    %c0_2 = arith.constant 0 : index
    %2 = vector.load %arg2[%c0_1, %c0_2] : memref<544x128xbf16, #tpu.memory_space<vmem>>, vector<544x128xbf16>
    %cst = arith.constant dense<0.000000e+00> : vector<16x128xf32>
    %3 = tpu.matmul %1, %2, %cst {dimension_numbers = #tpu.dot_dimension_numbers<[1], [0], [0], [1], [0, 0, 1, 1], [], []>} : vector<16x544xbf16>, vector<544x128xbf16>, vector<16x128xf32> -> vector<16x128xf32>
    %c0_3 = arith.constant 0 : index
    %c0_4 = arith.constant 0 : index
    %4 = vector.load %arg3[%c0_3, %c0_4] : memref<1x128xf32, #tpu.memory_space<vmem>>, vector<1x128xf32>
    %5 = vector.broadcast %4 : vector<1x128xf32> to vector<16x128xf32>
    %6 = arith.addf %3, %5 : vector<16x128xf32>
    %cst_5 = arith.constant 0.000000e+00 : f32
    %7 = vector.broadcast %cst_5 : f32 to vector<16x128xf32>
    %8 = arith.maximumf %6, %7 : vector<16x128xf32>
    %9 = arith.truncf %8 : vector<16x128xf32> to vector<16x128xbf16>
    %c0_6 = arith.constant 0 : index
    %c0_7 = arith.constant 0 : index
    %10 = vector.load %arg4[%c0_6, %c0_7] : memref<128x128xbf16, #tpu.memory_space<vmem>>, vector<128x128xbf16>
    %cst_8 = arith.constant dense<0.000000e+00> : vector<16x128xf32>
    %11 = tpu.matmul %9, %10, %cst_8 {dimension_numbers = #tpu.dot_dimension_numbers<[1], [0], [0], [1], [0, 0, 1, 1], [], []>} : vector<16x128xbf16>, vector<128x128xbf16>, vector<16x128xf32> -> vector<16x128xf32>
    %c0_9 = arith.constant 0 : index
    %c0_10 = arith.constant 0 : index
    %12 = vector.load %arg5[%c0_9, %c0_10] : memref<1x128xf32, #tpu.memory_space<vmem>>, vector<1x128xf32>
    %13 = vector.broadcast %12 : vector<1x128xf32> to vector<16x128xf32>
    %14 = arith.addf %11, %13 : vector<16x128xf32>
    %cst_11 = arith.constant 0.000000e+00 : f32
    %15 = vector.broadcast %cst_11 : f32 to vector<16x128xf32>
    %16 = arith.maximumf %14, %15 : vector<16x128xf32>
    %17 = arith.truncf %16 : vector<16x128xf32> to vector<16x128xbf16>
    %c0_12 = arith.constant 0 : index
    %c0_13 = arith.constant 0 : index
    %18 = vector.load %arg6[%c0_12, %c0_13] : memref<128x32xbf16, #tpu.memory_space<vmem>>, vector<128x32xbf16>
    %cst_14 = arith.constant dense<0.000000e+00> : vector<16x32xf32>
    %19 = tpu.matmul %17, %18, %cst_14 {dimension_numbers = #tpu.dot_dimension_numbers<[1], [0], [0], [1], [0, 0, 1, 1], [], []>} : vector<16x128xbf16>, vector<128x32xbf16>, vector<16x32xf32> -> vector<16x32xf32>
    %c0_15 = arith.constant 0 : index
    %c0_16 = arith.constant 0 : index
    %20 = vector.load %arg7[%c0_15, %c0_16] : memref<1x32xf32, #tpu.memory_space<vmem>>, vector<1x32xf32>
    %21 = vector.broadcast %20 : vector<1x32xf32> to vector<16x32xf32>
    %22 = arith.addf %19, %21 : vector<16x32xf32>
    %cst_17 = arith.constant 0.000000e+00 : f32
    %23 = vector.broadcast %cst_17 : f32 to vector<16x32xf32>
    %24 = arith.maximumf %22, %23 : vector<16x32xf32>
    %c0_18 = arith.constant 0 : index
    %c0_19 = arith.constant 0 : index
    %25 = vector.load %arg8[%c0_18, %c0_19] : memref<16x32xf32, #tpu.memory_space<vmem>>, vector<16x32xf32>
    tpu.vector_store %arg8[%c0_18, %c0_19], %24 {strides = array<i32>} : memref<16x32xf32, #tpu.memory_space<vmem>>, vector<16x32xf32>,
    return
  }
  func.func @transform_0(%arg0: i32) -> (i32, i32) {
    %c0_i32 = arith.constant 0 : i32
    %c0_i32_0 = arith.constant 0 : i32
    return %arg0, %c0_i32 : i32, i32
  }
  func.func @transform_1(%arg0: i32) -> (i32, i32) {
    %c0_i32 = arith.constant 0 : i32
    %c0_i32_0 = arith.constant 0 : i32
    %c0_i32_1 = arith.constant 0 : i32
    return %c0_i32, %c0_i32_0 : i32, i32
  }
  func.func @transform_2(%arg0: i32) -> (i32, i32) {
    %c0_i32 = arith.constant 0 : i32
    %c0_i32_0 = arith.constant 0 : i32
    %c0_i32_1 = arith.constant 0 : i32
    return %c0_i32, %c0_i32_0 : i32, i32
  }
  func.func @transform_3(%arg0: i32) -> (i32, i32) {
    %c0_i32 = arith.constant 0 : i32
    %c0_i32_0 = arith.constant 0 : i32
    %c0_i32_1 = arith.constant 0 : i32
    return %c0_i32, %c0_i32_0 : i32, i32
  }
  func.func @transform_4(%arg0: i32) -> (i32, i32) {
    %c0_i32 = arith.constant 0 : i32
    %c0_i32_0 = arith.constant 0 : i32
    %c0_i32_1 = arith.constant 0 : i32
    return %c0_i32, %c0_i32_0 : i32, i32
  }
  func.func @transform_5(%arg0: i32) -> (i32, i32) {
    %c0_i32 = arith.constant 0 : i32
    %c0_i32_0 = arith.constant 0 : i32
    %c0_i32_1 = arith.constant 0 : i32
    return %c0_i32, %c0_i32_0 : i32, i32
  }
  func.func @transform_6(%arg0: i32) -> (i32, i32) {
    %c0_i32 = arith.constant 0 : i32
    %c0_i32_0 = arith.constant 0 : i32
    %c0_i32_1 = arith.constant 0 : i32
    return %c0_i32, %c0_i32_0 : i32, i32
  }
  func.func @transform_7(%arg0: i32) -> (i32, i32) {
    %c0_i32 = arith.constant 0 : i32
    %c0_i32_0 = arith.constant 0 : i32
    return %arg0, %c0_i32 : i32, i32
  }
}

</mosaic_0001>

<bundles_post_ra>
// kernel: tpu_custom_call.1
= control target key start
LH: loop header
LB: loop body
LE: loop exit
PB: predicated region body
PF: predicated region fallthrough
CT: control target
= control target key end

     0   :  { %12 = vsyncpa [#allocation3], 0  ;;  %s1199_s0 = inlined_call_operand.vmem [shape: f32[16,544], index: 0, kind: input, shape index: {}]   ;;  %s1200_s1 = inlined_call_operand.hbm [shape: bf16[544,128], index: 1, kind: input, shape index: {}]   ;;  %s1201_s2 = inlined_call_operand.vmem [shape: f32[1,128], index: 2, kind: input, shape index: {}]   ;;  %s1202_s3 = inlined_call_operand.hbm [shape: bf16[128,128], index: 3, kind: input, shape index: {}]   ;;  %s1203_s4 = inlined_call_operand.vmem [shape: f32[1,128], index: 4, kind: input, shape index: {}]   ;;  %s1204_s5 = inlined_call_operand.vmem [shape: bf16[128,32], index: 5, kind: input, shape index: {}]   ;;  %s1205_s6 = inlined_call_operand.vmem [shape: f32[1,32], index: 6, kind: input, shape index: {}]   ;;  %s1206_s7 = inlined_call_operand.hbm [shape: f32[16,32], index: 7, kind: output, shape index: {}]  }
   0x1   :  { %13 = vsyncpa [#allocation6], 0 }
   0x2   :  { %14 = vsyncpa [#allocation4], 0  ;;  %s1027_s24 = smov [#allocation2]   ;;  %s955_s28 = scalar_lea.hbm %s1200_s1, 4352 }
   0x3   :  { %s22_s25 = sshll.u32 %s1027_s24, 4  ;;  %p956_p0 = scmp.ne.s32.totalorder %s1200_s1, %s955_s28  ;;  %s23_s25 = int_to_ptr.vmem [resolvable:$true] %s22_s25 }
   0x4   :  { %p959_p1 = scmp.lt.u32.totalorder %s955_s28, %s1200_s1 }
   0x6   :  { %p961_p2 = pnand %p959_p1, %p956_p0 }
   0x8   :  { %964 = shalt.err (!%p961_p2)
}
   0x9   :  { %s965_s10 = scalar_lea.vmem %s23_s25, 4352  ;;  %p970_p4 = scmp.lt.s32.totalorder %s23_s25, %s23_s25 }
   0xa   :  { %p966_p3 = scmp.ne.s32.totalorder %s23_s25, %s965_s10  ;;  %p971_p5 = scmp.lt.s32.totalorder %s965_s10, %s965_s10 }
   0xc   :  { %p972_p6 = por %p971_p5, %p970_p4 }
   0xe   :  { %p973_p7 = pnand %p972_p6, %p966_p3 }
  0x10   :  { %976 = shalt.err (!%p973_p7)
}
  0x11   :  { %s1028_s11 = smov 64   ;;  %s1029_s12 = smov 4  }
  0x12   :  { %28 = dma.hbm_to_vmem [thread:$0]  %s1200_s1, 4352, %s23_s25, [#allocation3], %s1028_s11, %s1028_s11, %s1029_s12  }
  0x13   :  { %s1030_s15 = smov [#allocation5]   ;;  %s977_s19 = scalar_lea.hbm %s1202_s3, 1024 }
  0x14   :  { %s36_s16 = sshll.u32 %s1030_s15, 4  ;;  %p978_p8 = scmp.ne.s32.totalorder %s1202_s3, %s977_s19  ;;  %s37_s16 = int_to_ptr.vmem [resolvable:$true] %s36_s16 }
  0x15   :  { %p981_p9 = scmp.lt.u32.totalorder %s977_s19, %s1202_s3 }
  0x17   :  { %p983_p10 = pnand %p981_p9, %p978_p8 }
  0x19   :  { %986 = shalt.err (!%p983_p10)
}
  0x1a   :  { %s987_s24 = scalar_lea.vmem %s37_s16, 1024  ;;  %p992_p12 = scmp.lt.s32.totalorder %s37_s16, %s37_s16 }
  0x1b   :  { %p988_p11 = scmp.ne.s32.totalorder %s37_s16, %s987_s24  ;;  %p993_p13 = scmp.lt.s32.totalorder %s987_s24, %s987_s24 }
  0x1d   :  { %p994_p0 = por %p993_p13, %p992_p12 }
  0x1f   :  { %p995_p1 = pnand %p994_p0, %p988_p11 }
  0x21   :  { %998 = shalt.err (!%p995_p1)
}
  0x22   :  { %42 = dma.hbm_to_vmem [thread:$0]  %s1202_s3, 1024, %s37_s16, [#allocation6], %s1028_s11, %s1028_s11, %s1029_s12  }
  0x23   :  { %1021 = dma.done.wait [#allocation3], 4352  }
  0x24   :  { %1022 = vsyncadd [#allocation3], 4294962944 }
  0x25   :  { %1023 = dma.done.wait [#allocation6], 1024  }
  0x26   :  { %1024 = vsyncadd [#allocation6], 4294966272  ;;  %v905_v0 = vld [vmem:[#allocation2 + $0x40] sm:$0xff]   ;;  %v909_v4 = vld [vmem:[#allocation2 + $0x48] sm:$0xff]   ;;  %v1031_v35 = vmov 0.0   ;;  %vm1032_vm0 = vmmov 0  }
  0x27   :  { %v906_v1 = vld [vmem:[#allocation2] sm:$0xff]   ;;  %783 = vmatprep.subr.bf16.mxu0 %v905_v0  ;;  %v910_v5 = vld [vmem:[#allocation2 + $0x8] sm:$0xff]   ;;  %v913_v8 = vld [vmem:[#allocation2 + $0x50] sm:$0xff]   ;;  %vm350_vm1 = vcmask 261120  }
  0x28   :  { %v907_v2 = vld [vmem:[#allocation2 + $0xc0] sm:$0xff]   ;;  %784 = vmatpush3.bf16.msra.mxu0 %v906_v1  ;;  %v911_v6 = vld [vmem:[#allocation2 + $0xc8] sm:$0xff]   ;;  %v914_v9 = vld [vmem:[#allocation2 + $0x10] sm:$0xff]  }
  0x29   :  { %v908_v3 = vld [vmem:[#allocation2 + $0x80] sm:$0xff]   ;;  %805 = vmatprep.subr.bf16.mxu1 %v907_v2  ;;  %785 = vmatprep.subr.bf16.mxu0 %v909_v4  ;;  %v912_v7 = vld [vmem:[#allocation2 + $0x88] sm:$0xff]   ;;  %v915_v10 = vld [vmem:[#allocation2 + $0xd0] sm:$0xff]  }
  0x2a   :  { %806 = vmatpush3.bf16.msra.mxu1 %v908_v3  ;;  %v916_v11 = vld [vmem:[#allocation2 + $0x90] sm:$0xff]   ;;  %v917_v12 = vld [vmem:[#allocation2 + $0x58] sm:$0xff]   ;;  %v921_v16 = vld [vmem:[#allocation2 + $0x60] sm:$0xff]  }
  0x2b   :  { %807 = vmatprep.subr.bf16.mxu1 %v911_v6  ;;  %v918_v13 = vld [vmem:[#allocation2 + $0x18] sm:$0xff]   ;;  %v922_v17 = vld [vmem:[#allocation2 + $0x20] sm:$0xff]   ;;  %v925_v20 = vld [vmem:[#allocation2 + $0x68] sm:$0xff]  }
  0x2c   :  { %786 = vmatpush3.bf16.msra.mxu0 %v910_v5  ;;  %v919_v14 = vld [vmem:[#allocation2 + $0xd8] sm:$0xff]   ;;  %v923_v18 = vld [vmem:[#allocation2 + $0xe0] sm:$0xff]   ;;  %v926_v21 = vld [vmem:[#allocation2 + $0x28] sm:$0xff]  }
  0x2d   :  { %787 = vmatprep.subr.bf16.mxu0 %v913_v8  ;;  %v920_v15 = vld [vmem:[#allocation2 + $0x98] sm:$0xff]   ;;  %v924_v19 = vld [vmem:[#allocation2 + $0xa0] sm:$0xff]   ;;  %v927_v22 = vld [vmem:[#allocation2 + $0xe8] sm:$0xff]  }
  0x2e   :  { %808 = vmatpush3.bf16.msra.mxu1 %v912_v7  ;;  %v928_v23 = vld [vmem:[#allocation2 + $0xa8] sm:$0xff]   ;;  %v929_v24 = vld [vmem:[#allocation2 + $0x70] sm:$0xff]   ;;  %v933_v28 = vld [vmem:[#allocation2 + $0x78] sm:$0xff]  }
  0x2f   :  { %809 = vmatprep.subr.bf16.mxu1 %v915_v10  ;;  %v930_v25 = vld [vmem:[#allocation2 + $0x30] sm:$0xff]   ;;  %v934_v29 = vld [vmem:[#allocation2 + $0x38] sm:$0xff]   ;;  %v57_v32 = vld [vmem:[%s1199_s0 + $0x8] sm:$0xff] }
  0x30   :  { %788 = vmatpush3.bf16.msra.mxu0 %v914_v9  ;;  %v931_v26 = vld [vmem:[#allocation2 + $0xf0] sm:$0xff]   ;;  %v935_v30 = vld [vmem:[#allocation2 + $0xf8] sm:$0xff]   ;;  %v56_v34 = vld [vmem:[%s1199_s0] sm:$0xff] }
  0x31   :  { %789 = vmatprep.subr.bf16.mxu0 %v917_v12  ;;  %v932_v27 = vld [vmem:[#allocation2 + $0xb0] sm:$0xff]   ;;  %v936_v31 = vld [vmem:[#allocation2 + $0xb8] sm:$0xff]   ;;  %v61_v37 = vld [vmem:[%s1199_s0 + $0x28] sm:$0xff] }
  0x32   :  { %810 = vmatpush3.bf16.msra.mxu1 %v916_v11  ;;  %v62_v33 = vld [vmem:[%s1199_s0 + $0x30] sm:$0xff]  ;;  %v59_v38 = vld [vmem:[%s1199_s0 + $0x18] sm:$0xff]  ;;  %v64_v39 = vld [vmem:[%s1199_s0 + $0x40] sm:$0xff]  ;;  %v66_v40 = vpack.c.bf16 %v61_v37, %v56_v34 }
  0x33   :  { %811 = vmatprep.subr.bf16.mxu1 %v919_v14  ;;  %v67_v36 = vpack.c.bf16 %v62_v33, %v57_v32  ;;  %v69_v41 = vpack.c.bf16 %v64_v39, %v59_v38  ;;  %v58_v42 = vld [vmem:[%s1199_s0 + $0x10] sm:$0xff]  ;;  %v63_v43 = vld [vmem:[%s1199_s0 + $0x38] sm:$0xff]  ;;  %v937_v45 = vld [vmem:[#allocation2 + $0x100] sm:$0xff]  }
  0x34   :  { %790 = vmatpush3.bf16.msra.mxu0 %v918_v13  ;;  %v68_v44 = vpack.c.bf16 %v63_v43, %v58_v42  ;;  %v938_v46 = vld [vmem:[#allocation2 + $0x108] sm:$0xff]   ;;  %v60_v47 = vld [vmem:[%s1199_s0 + $0x20] sm:$0xff]  ;;  %v939_v49 = vld [vmem:[#allocation5] sm:$0xff]  }
  0x35   :  { %791 = vmatprep.subr.bf16.mxu0 %v921_v16  ;;  %386 = vmatprep.mubr.bf16.mxu0 %v67_v36  ;;  %v65_v48 = vld [vmem:[%s1199_s0 + $0x48] sm:$0xff]  ;;  %v940_v51 = vld [vmem:[#allocation5 + $0x8] sm:$0xff]   ;;  %v941_v52 = vld [vmem:[#allocation5 + $0x10] sm:$0xff]  }
  0x36   :  { %812 = vmatpush3.bf16.msra.mxu1 %v920_v15  ;;  %427 = vmatprep.mubr.bf16.mxu1 %v69_v41  ;;  %v70_v50 = vpack.c.bf16 %v65_v48, %v60_v47  ;;  %v942_v53 = vld [vmem:[#allocation5 + $0x18] sm:$0xff]   ;;  %v943_v54 = vld [vmem:[#allocation5 + $0x20] sm:$0xff]   ;;  %v944_v55 = vld [vmem:[#allocation5 + $0x28] sm:$0xff]  }
  0x37   :  { %813 = vmatprep.subr.bf16.mxu1 %v923_v18  ;;  %v945_v56 = vld [vmem:[#allocation5 + $0x30] sm:$0xff]   ;;  %v946_v57 = vld [vmem:[#allocation5 + $0x38] sm:$0xff]   ;;  %v949_v60 = vld [vmem:[%s1204_s5 + $0x10] sm:$0xff]  }
  0x38   :  { %792 = vmatpush3.bf16.msra.mxu0 %v922_v17  ;;  %v947_v58 = vld [vmem:[%s1204_s5] sm:$0xff]   ;;  %v948_v59 = vld [vmem:[%s1204_s5 + $0x8] sm:$0xff]   ;;  %v950_v61 = vld [vmem:[%s1204_s5 + $0x18] sm:$0xff]  }
  0x39   :  { %793 = vmatprep.subr.bf16.mxu0 %v925_v20  ;;  %v951_v62 = vld [vmem:[%s1204_s5 + $0x20] sm:$0xff]   ;;  %v952_v63 = vld [vmem:[%s1204_s5 + $0x28] sm:$0xff]  }
  0x3a   :  { %814 = vmatpush3.bf16.msra.mxu1 %v924_v19  ;;  %v729_v1 = vld [vmem:[%s1201_s2] ss:$0 sm:$0xff] }
  0x3b   :  { %815 = vmatprep.subr.bf16.mxu1 %v927_v22 }
  0x3c   :  { %794 = vmatpush3.bf16.msra.mxu0 %v926_v21 }
  0x3d   :  { %795 = vmatprep.subr.bf16.mxu0 %v929_v24 }
  0x3e   :  { %816 = vmatpush3.bf16.msra.mxu1 %v928_v23 }
  0x3f   :  { %817 = vmatprep.subr.bf16.mxu1 %v931_v26  ;;  %v953_v26 = vld [vmem:[%s1204_s5 + $0x30] sm:$0xff]  }
  0x40   :  { %796 = vmatpush3.bf16.msra.mxu0 %v930_v25 }
  0x41   :  { %797 = vmatprep.subr.bf16.mxu0 %v933_v28  ;;  %v765_v28 = vld [vmem:[%s1203_s4] ss:$0 sm:$0xff] }
  0x42   :  { %818 = vmatpush3.bf16.msra.mxu1 %v932_v27  ;;  %v954_v27 = vld [vmem:[%s1204_s5 + $0x38] sm:$0xff]   ;;  %s1033_s5 = smov [#allocation7]  }
  0x43   :  { %819 = vmatprep.subr.bf16.mxu1 %v935_v30  ;;  %s716_s4 = sshll.u32 %s1033_s5, 4  ;;  %s717_s4 = int_to_ptr.vmem [resolvable:$true] %s716_s4 }
  0x44   :  { %798 = vmatpush3.bf16.msra.mxu0 %v934_v29  ;;  %s999_s17 = scalar_lea.vmem %s717_s4, 256  ;;  %p1004_p3 = scmp.lt.s32.totalorder %s717_s4, %s717_s4 }
  0x45   :  { %848 = vmatprep.subr.bf16.mxu0 %v1031_v35  ;;  %p1000_p2 = scmp.ne.s32.totalorder %s717_s4, %s999_s17  ;;  %p1005_p4 = scmp.lt.s32.totalorder %s999_s17, %s999_s17 }
  0x46   :  { %820 = vmatpush3.bf16.msra.mxu1 %v936_v31 }
  0x47   :  { %856 = vmatprep.subr.bf16.mxu1 %v1031_v35  ;;  %387 = vmatmul.mubr.bf16.vlgmr.msra.gmra.mrb[0].mxu0 %v66_v40  ;;  %p1006_p5 = por %p1005_p4, %p1004_p3 }
  0x48   :  { %849 = vmatpush3.bf16.msra.mxu0 %v937_v45  ;;  %852 = vmatprep.mubr.msk.bf16.mxu0 %vm1032_vm0, %v1031_v35 }
  0x49   :  { %428 = vmatmul.mubr.bf16.vlgmr.msra.gmra.mrb[0].mxu1 %v68_v44  ;;  %850 = vmatprep.subr.bf16.mxu0 %v1031_v35  ;;  %p1007_p6 = pnand %p1006_p5, %p1000_p2 }
  0x4a   :  { %872 = vmatprep.mubr.msk.bf16.mxu1 %vm1032_vm0, %v1031_v35  ;;  %857 = vmatpush3.bf16.msra.mxu1 %v939_v49 }
  0x4b   :  { %858 = vmatprep.subr.bf16.mxu1 %v1031_v35 }
  0x4c   :  { %851 = vmatpush3.bf16.msra.mxu0 %v938_v46 }
  0x4d   :  { %876 = vmatprep.subr.bf16.mxu0 %v1031_v35 }
  0x4e   :  { %859 = vmatpush3.bf16.msra.mxu1 %v940_v51 }
  0x4f   :  { %853 = vmatmul.mubr.msk.bf16.vlgmr.msra.gmra.mrb[4].mxu0 %vm350_vm1, %v70_v50  ;;  %860 = vmatprep.subr.bf16.mxu1 %v1031_v35 }
  0x50   :  { %892 = vmatprep.mubr.msk.bf16.mxu0 %vm1032_vm0, %v1031_v35  ;;  %877 = vmatpush3.bf16.msra.mxu0 %v947_v58 }
  0x51   :  { %878 = vmatprep.subr.bf16.mxu0 %v1031_v35 }
  0x52   :  { %861 = vmatpush3.bf16.msra.mxu1 %v941_v52 }
  0x53   :  { %862 = vmatprep.subr.bf16.mxu1 %v1031_v35 }
  0x54   :  { %879 = vmatpush3.bf16.msra.mxu0 %v948_v59 }
  0x55   :  { %880 = vmatprep.subr.bf16.mxu0 %v1031_v35 }
  0x56   :  { %863 = vmatpush3.bf16.msra.mxu1 %v942_v53 }
  0x57   :  { %864 = vmatprep.subr.bf16.mxu1 %v1031_v35 }
  0x58   :  { %881 = vmatpush3.bf16.msra.mxu0 %v949_v60 }
  0x59   :  { %882 = vmatprep.subr.bf16.mxu0 %v1031_v35 }
  0x5a   :  { %865 = vmatpush3.bf16.msra.mxu1 %v943_v54 }
  0x5b   :  { %866 = vmatprep.subr.bf16.mxu1 %v1031_v35 }
  0x5c   :  { %883 = vmatpush3.bf16.msra.mxu0 %v950_v61 }
  0x5d   :  { %884 = vmatprep.subr.bf16.mxu0 %v1031_v35 }
  0x5e   :  { %867 = vmatpush3.bf16.msra.mxu1 %v944_v55 }
  0x5f   :  { %868 = vmatprep.subr.bf16.mxu1 %v1031_v35 }
  0x60   :  { %885 = vmatpush3.bf16.msra.mxu0 %v951_v62 }
  0x61   :  { %886 = vmatprep.subr.bf16.mxu0 %v1031_v35 }
  0x62   :  { %869 = vmatpush3.bf16.msra.mxu1 %v945_v56 }
  0x63   :  { %870 = vmatprep.subr.bf16.mxu1 %v1031_v35 }
  0x64   :  { %887 = vmatpush3.bf16.msra.mxu0 %v952_v63 }
  0x65   :  { %888 = vmatprep.subr.bf16.mxu0 %v1031_v35 }
  0x66   :  { %871 = vmatpush3.bf16.msra.mxu1 %v946_v57 }
  0x68   :  { %889 = vmatpush3.bf16.msra.mxu0 %v953_v26 }
  0x69   :  { %890 = vmatprep.subr.bf16.mxu0 %v1031_v35  ;;  %v774_v35 = vld [vmem:[%s1205_s6] ss:$0 sm:$0xff] }
  0x6c   :  { %891 = vmatpush3.bf16.msra.mxu0 %v954_v27 }
 0x11a   :  { %v799_v0 = vpop.f32.mrb[0].mxu0 }
 0x11b   :  { %v800_v2 = vpop.f32.mrb[1].mxu0 }
 0x11c   :  { %v821_v3 = vpop.f32.mrb[0].mxu1  ;;  %v801_v4 = vadd.f32 %v800_v2, %v799_v0  ;;  %v802_v5 = vpop.f32.mrb[2].mxu0 }
 0x11d   :  { %v822_v6 = vpop.f32.mrb[1].mxu1  ;;  %v803_v8 = vpop.f32.mrb[3].mxu0 }
 0x11e   :  { %v823_v7 = vadd.f32 %v822_v6, %v821_v3  ;;  %v824_v9 = vpop.f32.mrb[2].mxu1  ;;  %v389_v10 = vadd.f32 %v801_v4, %v729_v1  ;;  %v804_v11 = vadd.f32 %v803_v8, %v802_v5 }
 0x11f   :  { %v825_v12 = vpop.f32.mrb[3].mxu1 }
 0x120   :  { %v826_v13 = vadd.f32 %v825_v12, %v824_v9  ;;  %v392_v14 = vadd.f32 %v804_v11, %v729_v1  ;;  %v430_v15 = vadd.f32 %v823_v7, %v389_v10 }
 0x122   :  { %v470_v16 = vpop.f32.mrb[4].mxu0  ;;  %v433_v17 = vadd.f32 %v826_v13, %v392_v14 }
 0x123   :  { %v471_v18 = vadd.f32 %v470_v16, %v430_v15  ;;  %v854_v19 = vpop.f32.mrb[5].mxu0 }
 0x124   :  { %v473_v20 = vpop.f32.mrb[6].mxu0 }
 0x125   :  { %v474_v21 = vadd.f32 %v473_v20, %v433_v17  ;;  %v855_v22 = vpop.f32.mrb[7].mxu0  ;;  %v477_v23 = vmax.f32 %v471_v18, 0.0 }
 0x127   :  { %v478_v24 = vmax.f32 %v474_v21, 0.0 }
 0x129   :  { %v479_v25 = vpack.c.bf16 %v478_v24, %v477_v23 }
 0x12b   :  { %873 = vmatmul.mubr.bf16.vlgmr.msra.gmra.mrb[4].mxu1 %v479_v25 }
 0x1fe   :  { %v585_v29 = vpop.f32.mrb[4].mxu1 }
 0x1ff   :  { %v586_v30 = vadd.f32 %v765_v28, %v585_v29  ;;  %v874_v31 = vpop.f32.mrb[5].mxu1 }
 0x200   :  { %v588_v32 = vpop.f32.mrb[6].mxu1 }
 0x201   :  { %v589_v33 = vadd.f32 %v765_v28, %v588_v32  ;;  %v875_v34 = vpop.f32.mrb[7].mxu1  ;;  %v592_v36 = vmax.f32 %v586_v30, 0.0 }
 0x203   :  { %v593_v37 = vmax.f32 %v589_v33, 0.0 }
 0x205   :  { %v594_v38 = vpack.c.bf16 %v593_v37, %v592_v36 }
 0x207   :  { %893 = vmatmul.mubr.bf16.vlgmr.msra.gmra.mrb[8].mxu0 %v594_v38 }
 0x2da   :  { %v700_v39 = vpop.f32.mrb[8].mxu0 }
 0x2db   :  { %v701_v40 = vadd.f32 %v774_v35, %v700_v39  ;;  %v894_v41 = vpop.f32.mrb[9].mxu0 }
 0x2dc   :  { %v703_v42 = vpop.f32.mrb[10].mxu0 }
 0x2dd   :  { %v707_v43 = vmax.f32 %v701_v40, 0.0  ;;  %v704_v44 = vadd.f32 %v774_v35, %v703_v42  ;;  %v895_v45 = vpop.f32.mrb[11].mxu0 }
 0x2df   :  { %709 = vst.msk [vmem:[#allocation7] sm:$0xff] %vm350_vm1, %v707_v43  ;;  %v708_v46 = vmax.f32 %v704_v44, 0.0 }
 0x2e1   :  { %710 = vst.msk [vmem:[#allocation7 + $0x8] sm:$0xff] %vm350_vm1, %v708_v46 }
 0x2e2   :  { %1010 = shalt.err (!%p1007_p6)
}
 0x2e3   :  { %s1011_s19 = scalar_lea.hbm %s1206_s7, 256 }
 0x2e4   :  { %p1012_p7 = scmp.ne.s32.totalorder %s1206_s7, %s1011_s19  ;;  %p1015_p8 = scmp.lt.u32.totalorder %s1011_s19, %s1206_s7 }
 0x2e6   :  { %p1017_p9 = pnand %p1015_p8, %p1012_p7 }
 0x2e8   :  { %1020 = shalt.err (!%p1017_p9)
}
 0x2e9   :  { %s1034_s23 = smov 128   ;;  %s1035_s24 = smov 8  }
 0x2ea   :  { %722 = dma.vmem_to_hbm [thread:$0]  %s717_s4, 256, %s1206_s7, [#allocation4], %s1034_s23, %s1034_s23, %s1035_s24  }
 0x2eb   :  { %1025 = dma.done.wait [#allocation4], 256  }
 0x2ec   :  { %1026 = vsyncadd [#allocation4], 4294967040 }
 0x2ed   :  { %726 = vsyncpa [#allocation3], 1 }
 0x2ee   :  { %727 = vsyncpa [#allocation6], 1 }
 0x2ef   :  { %728 = vsyncpa [#allocation4], 1 }

</bundles_post_ra>
